<compile_context>
chip_gen: v7x
topology: tpu7x:2x2x1
jax: 0.10.0
libtpu: 0.0.40
codegen_flags: <defaults>
</compile_context>

<pallas_src>
import functools

import jax
import jax.numpy as jnp
from jax import lax
from jax.experimental import pallas as pl
from jax.experimental.pallas import tpu as pltpu

EMBED_DIM = 128   # small stand-in for the PyTorch default embed_dim=1280
LANES = 128       # TPU lane width -- narrow output dims are padded up to this


# ---------------------------------------------------------------------------
# Kernel 1: replaced xception.conv1 (Conv2d 32->32, k=3, s=2, p=1, bias=False)
# as an im2col GEMM against the FUSED (conv1 ⊗ head_w) weight, with the global
# spatial mean + head_b fused into the tail (per-batch accumulator).
#   feat[b] = mean_{oh,ow}( patches[b] @ W_fused ) + head_b
# ---------------------------------------------------------------------------
def _conv_pool_kernel(p_ref, w_ref, hb_ref, o_ref, *, inv_hw):
    # p_ref : (TM, K) bf16 im2col patch tile of batch b
    # w_ref : (K, E) bf16 fused conv1⊗head weight (resident)
    # hb_ref: (1, E) f32 head bias
    # o_ref : (1, E) f32 pooled-feature accumulator for batch b
    m = pl.program_id(1)

    @pl.when(m == 0)
    def _():
        o_ref[...] = jnp.zeros_like(o_ref)

    tile = jnp.dot(p_ref[...], w_ref[...], preferred_element_type=jnp.float32)
    o_ref[...] += jnp.sum(tile, axis=0, keepdims=True)

    @pl.when(m == pl.num_programs(1) - 1)
    def _():
        o_ref[...] = o_ref[...] * inv_hw + hb_ref[...]


def conv_backbone_pallas(x, conv_head_w, head_b):
    """x: (B, 32, H, W) NCHW f32; conv_head_w: (288, E) bf16; head_b: (1, E) f32.

    Returns pooled features (B, E) f32 == mean_hw(conv1(x)) @ head_w.T + head_b."""
    B, C, H, W = x.shape
    KH = KW = 3
    Ho = (H + 2 - KH) // 2 + 1
    Wo = (W + 2 - KW) // 2 + 1
    K = C * KH * KW
    E = conv_head_w.shape[1]

    # Channels-last patch extraction (no 6-D transpose).
    # TODO(synk): at full Xception scale build patches in-kernel (row-band DMA +
    # 9 shifted taps) to kill the 9x HBM im2col amplification entirely.
    xn = jnp.transpose(x, (0, 2, 3, 1))                       # NHWC
    xp = jnp.pad(xn, ((0, 0), (1, 1), (1, 1), (0, 0)))
    cols = [xp[:, kh:kh + 2 * Ho:2, kw:kw + 2 * Wo:2, :]      # (B, Ho, Wo, C)
            for kh in range(KH) for kw in range(KW)]
    p = jnp.concatenate(cols, axis=-1)                        # K order = (kh, kw, cin)
    p = p.reshape(B, Ho * Wo, K).astype(jnp.bfloat16)         # bf16 halves DMA bytes

    M = Ho * Wo
    TM = min(2048, ((M + 7) // 8) * 8)                        # big, sublane-aligned tile
    Mp = ((M + TM - 1) // TM) * TM
    if Mp != M:
        p = jnp.pad(p, ((0, 0), (0, Mp - M), (0, 0)))         # zero rows: no effect on sum

    out = pl.pallas_call(
        functools.partial(_conv_pool_kernel, inv_hw=1.0 / float(Ho * Wo)),
        out_shape=jax.ShapeDtypeStruct((B, 1, E), jnp.float32),
        grid=(B, Mp // TM),
        in_specs=[pl.BlockSpec((None, TM, K), lambda b, m: (b, m, 0)),
                  pl.BlockSpec((K, E), lambda b, m: (0, 0)),      # resident fused weight
                  pl.BlockSpec((1, E), lambda b, m: (0, 0))],
        out_specs=pl.BlockSpec((None, 1, E), lambda b, m: (b, 0, 0)),
        compiler_params=pltpu.CompilerParams(
            dimension_semantics=("parallel", "arbitrary"),
            vmem_limit_bytes=32 * 1024 * 1024),
    )(p, conv_head_w, head_b)
    return out.reshape(B, E)


# ---------------------------------------------------------------------------
# Kernel 2: fused CrossAttention + fc residual + output_fc head (feat1 == feat2).
#   qkv = f @ [Wq|Wk|Wv] + [bq|bk|bv]
#   A = softmax(Q K^T * scale) ; attn = A V
#   out = f @ Wout_p + attn @ (Wfc.T @ Wout_p) + (bfc @ Wout_p + bout_p)
# bf16 MXU operands, f32 accumulation/softmax; lane-dense 128-wide output.
# ---------------------------------------------------------------------------
def _head_kernel(f_ref, wqkv_ref, bqkv_ref, wout_ref, wfco_ref, bf_ref, o_ref,
                 *, scale, e):
    f = f_ref[...]                                  # (B, E) f32
    fb = f.astype(jnp.bfloat16)

    qkv = jnp.dot(fb, wqkv_ref[...], preferred_element_type=jnp.float32) + bqkv_ref[...]
    q = qkv[:, :e]
    k = qkv[:, e:2 * e]
    v = qkv[:, 2 * e:]

    # Q K^T via dot_general contracting the last dims (no explicit XLU transpose).
    s = lax.dot_general(q.astype(jnp.bfloat16), k.astype(jnp.bfloat16),
                        (((1,), (1,)), ((), ())),
                        preferred_element_type=jnp.float32) * scale
    s = s - jnp.max(s, axis=-1, keepdims=True)      # softmax stays f32 (VPU/EUP)
    ex = jnp.exp(s)
    a = ex * pl.reciprocal(jnp.sum(ex, axis=-1, keepdims=True), approx=True)
    attn = jnp.dot(a.astype(jnp.bfloat16), v.astype(jnp.bfloat16),
                   preferred_element_type=jnp.float32)

    o_ref[...] = (jnp.dot(fb, wout_ref[...], preferred_element_type=jnp.float32)
                  + jnp.dot(attn.astype(jnp.bfloat16), wfco_ref[...],
                            preferred_element_type=jnp.float32)
                  + bf_ref[...])


def fused_head_pallas(feat, prep, n_out):
    B, E = feat.shape
    scale = float(E) ** (-0.5)                      # derived from feat, not a kwarg

    args = [feat, prep["wqkv"], prep["bqkv"], prep["wout_p"], prep["wfc_out"],
            prep["b_fold"]]
    in_specs = [pl.BlockSpec(a.shape, lambda i: (0, 0)) for a in args]   # all 2-D

    # TODO(synk): at the real embed_dim=1280, K-tile the (E,3E)/(E,128) weights
    # over E (grid axis "arbitrary" + f32 accumulator) or single-buffer them
    # (pipeline_mode=pl.Buffered(1)) and set vmem_limit_bytes for v5e/v7x.
    out = pl.pallas_call(
        functools.partial(_head_kernel, scale=scale, e=E),
        out_shape=jax.ShapeDtypeStruct((B, LANES), jnp.float32),
        grid=(1,),
        in_specs=in_specs,
        out_specs=pl.BlockSpec((B, LANES), lambda i: (0, 0)),
        compiler_params=pltpu.CompilerParams(
            dimension_semantics=("arbitrary",)),
    )(*args)
    return out[:, :n_out]


# ---------------------------------------------------------------------------
# One-time parameter prep (hoisted out of the forward): transposes, pads,
# bf16 casts and the two algebraic folds (conv⊗head_w, Wfc⊗Wout).
# ---------------------------------------------------------------------------
def prepare_params(params):
    bf16 = jnp.bfloat16
    E = params["wq"].shape[0]
    n_out = params["wout"].shape[0]

    # conv1 (OIHW) flattened with row order (kh, kw, cin) to match patch K order,
    # then folded with the backbone head linear: (288, 32) @ (32, E) -> (288, E).
    w = params["conv1_w"]
    wflat = jnp.transpose(w, (2, 3, 1, 0)).reshape(-1, w.shape[0])
    conv_head_w = (wflat @ params["head_w"].T).astype(bf16)
    head_b = params["head_b"].reshape(1, E).astype(jnp.float32)

    # Fused QKV projection.
    wqkv = jnp.concatenate(
        [params["wq"].T, params["wk"].T, params["wv"].T], axis=1).astype(bf16)
    bqkv = jnp.concatenate(
        [params["bq"], params["bk"], params["bv"]]).reshape(1, 3 * E)

    # Fold fc + output_fc:  out = f@Wout_p + attn@(Wfc.T@Wout_p) + (bfc@Wout_p + bout_p)
    wout_p = jnp.pad(params["wout"].T, ((0, 0), (0, LANES - n_out)))        # (E,128) f32
    wfc_out = (params["wfc"].T @ wout_p).astype(bf16)                       # (E,128)
    b_fold = (params["bfc"].reshape(1, E) @ wout_p
              + jnp.pad(params["bout"].reshape(1, n_out), ((0, 0), (0, LANES - n_out))))

    return {"conv_head_w": conv_head_w, "head_b": head_b,
            "wqkv": wqkv, "bqkv": bqkv,
            "wout_p": wout_p.astype(bf16), "wfc_out": wfc_out, "b_fold": b_fold}


# ---------------------------------------------------------------------------
# Full forward: two pallas_calls, no per-call weight re-layout.
# ---------------------------------------------------------------------------
@functools.partial(jax.jit, static_argnames=("n_out",))
def custom_xception_forward(x, prep, n_out=2):
    # x1 = x2 = x in the module forward, so feat1 == feat2: compute once.
    feat = conv_backbone_pallas(x, prep["conv_head_w"], prep["head_b"])
    return fused_head_pallas(feat, prep, n_out)


# ---------------------------------------------------------------------------
# Pure-JAX reference (mirrors the PyTorch forward, all f32, no folds).
# ---------------------------------------------------------------------------
def reference_forward(x, params, embed_dim=EMBED_DIM):
    h = jax.lax.conv_general_dilated(
        x, params["conv1_w"], window_strides=(2, 2), padding=((1, 1), (1, 1)),
        dimension_numbers=("NCHW", "OIHW", "NCHW"))
    pooled = jnp.mean(h, axis=(2, 3))
    f1 = pooled @ params["head_w"].T + params["head_b"]
    f2 = f1                                                   # x1 == x2
    q = f1 @ params["wq"].T + params["bq"]
    k = f2 @ params["wk"].T + params["bk"]
    v = f2 @ params["wv"].T + params["bv"]
    s = (q @ k.T) * (float(embed_dim) ** -0.5)
    a = jax.nn.softmax(s, axis=-1)
    attn = a @ v
    combined = f1 + (attn @ params["wfc"].T + params["bfc"])
    return combined @ params["wout"].T + params["bout"]


# ---------------------------------------------------------------------------
# Deterministic parameter init (PyTorch-style uniform(-1/sqrt(fan_in), ...)).
# ---------------------------------------------------------------------------
def init_params(key, embed_dim=EMBED_DIM):
    keys = jax.random.split(key, 8)

    def lin(k, fan_in, fan_out):
        kw, kb = jax.random.split(k)
        bound = 1.0 / float(fan_in) ** 0.5
        wgt = jax.random.uniform(kw, (fan_out, fan_in), jnp.float32, -bound, bound)
        b = jax.random.uniform(kb, (fan_out,), jnp.float32, -bound, bound)
        return wgt, b

    params = {}
    cb = 1.0 / float(32 * 9) ** 0.5
    params["conv1_w"] = jax.random.uniform(keys[0], (32, 32, 3, 3), jnp.float32, -cb, cb)
    # TODO(synk): the pretrained Xception body beyond the replaced conv1 has no
    # in-script equivalent; it is stood in by mean-pool + this linear to embed_dim.
    params["head_w"], params["head_b"] = lin(keys[1], 32, embed_dim)
    params["wq"], params["bq"] = lin(keys[2], embed_dim, embed_dim)
    params["wk"], params["bk"] = lin(keys[3], embed_dim, embed_dim)
    params["wv"], params["bv"] = lin(keys[4], embed_dim, embed_dim)
    params["wfc"], params["bfc"] = lin(keys[5], embed_dim, embed_dim)
    params["wout"], params["bout"] = lin(keys[6], embed_dim, 2)
    return params


if __name__ == "__main__":
    key = jax.random.PRNGKey(0)
    kx, kp = jax.random.split(key)

    B, C, H, W = 2, 32, 16, 16        # conv1 requires 32 input channels
    x = jax.random.normal(kx, (B, C, H, W), jnp.float32)
    params = init_params(kp)
    prep = prepare_params(params)      # one-time weight prep (hoisted out of forward)

    out = custom_xception_forward(x, prep, n_out=2)
    out = jax.block_until_ready(out)

    ref = jax.block_until_ready(reference_forward(x, params))
    assert out.shape == (B, 2), out.shape
    # bf16 MXU operands, approx reciprocal and the algebraic folds loosen the
    # tolerance vs. the f32 unfused reference.
    assert jnp.allclose(out, ref, atol=2e-2, rtol=2e-2), (out, ref)
    print("KERNEL_OK")
</pallas_src>

<mosaic_0001>
module attributes {stable_mosaic.version = 11 : i64} {
  func.func @_conv_pool_kernel(%arg0: i32, %arg1: i32, %arg2: memref<1x64x288xbf16, #tpu.memory_space<vmem>>, %arg3: memref<288x128xbf16, #tpu.memory_space<vmem>>, %arg4: memref<1x128xf32, #tpu.memory_space<vmem>>, %arg5: memref<1x1x128xf32, #tpu.memory_space<vmem>>) attributes {dimension_semantics = [#tpu.dimension_semantics<parallel>, #tpu.dimension_semantics<arbitrary>], iteration_bounds = array<i64: 2, 1>, scalar_prefetch = 0 : i64, scratch_operands = 0 : i64, tpu.core_type = #tpu.core_type<tc>, window_params = [{transform_indices = @transform_0, window_bounds = array<i64: 1, 64, 288>}, {pipeline_mode = #tpu.pipeline_mode<synchronous>, transform_indices = @transform_1, window_bounds = array<i64: 288, 128>}, {pipeline_mode = #tpu.pipeline_mode<synchronous>, transform_indices = @transform_2, window_bounds = array<i64: 1, 128>}, {transform_indices = @transform_3, window_bounds = array<i64: 1, 1, 128>}]} {
    %c0_i32 = arith.constant 0 : i32
    %0 = arith.cmpi eq, %arg1, %c0_i32 : i32
    %1 = arith.extui %0 : i1 to i32
    %c0_i32_0 = arith.constant 0 : i32
    %2 = arith.cmpi ne, %1, %c0_i32_0 : i32
    scf.if %2 {
      %cst_14 = arith.constant 0.000000e+00 : f32
      %18 = vector.broadcast %cst_14 : f32 to vector<1x128xf32>
      %c0_15 = arith.constant 0 : index
      %c0_16 = arith.constant 0 : index
      %c0_17 = arith.constant 0 : index
      %19 = vector.load %arg5[%c0_15, %c0_16, %c0_17] : memref<1x1x128xf32, #tpu.memory_space<vmem>>, vector<1x1x128xf32>
      %20 = vector.shape_cast %19 : vector<1x1x128xf32> to vector<1x128xf32>
      %21 = vector.shape_cast %18 : vector<1x128xf32> to vector<1x1x128xf32>
      tpu.vector_store %arg5[%c0_15, %c0_16, %c0_17], %21 {strides = array<i32>} : memref<1x1x128xf32, #tpu.memory_space<vmem>>, vector<1x1x128xf32>,
    } else {
    }
    %c0 = arith.constant 0 : index
    %c0_1 = arith.constant 0 : index
    %c0_2 = arith.constant 0 : index
    %3 = vector.load %arg2[%c0, %c0_1, %c0_2] : memref<1x64x288xbf16, #tpu.memory_space<vmem>>, vector<1x64x288xbf16>
    %4 = vector.shape_cast %3 : vector<1x64x288xbf16> to vector<64x288xbf16>
    %c0_3 = arith.constant 0 : index
    %c0_4 = arith.constant 0 : index
    %5 = vector.load %arg3[%c0_3, %c0_4] : memref<288x128xbf16, #tpu.memory_space<vmem>>, vector<288x128xbf16>
    %cst = arith.constant dense<0.000000e+00> : vector<64x128xf32>
    %6 = tpu.matmul %4, %5, %cst {dimension_numbers = #tpu.dot_dimension_numbers<[1], [0], [0], [1], [0, 0, 1, 1], [], []>} : vector<64x288xbf16>, vector<288x128xbf16>, vector<64x128xf32> -> vector<64x128xf32>
    %c0_5 = arith.constant 0 : index
    %c0_6 = arith.constant 0 : index
    %c0_7 = arith.constant 0 : index
    %7 = vector.load %arg5[%c0_5, %c0_6, %c0_7] : memref<1x1x128xf32, #tpu.memory_space<vmem>>, vector<1x1x128xf32>
    %8 = vector.shape_cast %7 : vector<1x1x128xf32> to vector<1x128xf32>
    %cst_8 = arith.constant dense<0.000000e+00> : vector<128xf32>
    %9 = vector.multi_reduction <add>, %6, %cst_8 [0] : vector<64x128xf32> to vector<128xf32>
    %10 = vector.shape_cast %9 : vector<128xf32> to vector<1x128xf32>
    %11 = arith.addf %8, %10 : vector<1x128xf32>
    %c0_9 = arith.constant 0 : index
    %c0_10 = arith.constant 0 : index
    %c0_11 = arith.constant 0 : index
    %12 = vector.load %arg5[%c0_9, %c0_10, %c0_11] : memref<1x1x128xf32, #tpu.memory_space<vmem>>, vector<1x1x128xf32>
    %13 = vector.shape_cast %12 : vector<1x1x128xf32> to vector<1x128xf32>
    %14 = vector.shape_cast %11 : vector<1x128xf32> to vector<1x1x128xf32>
    tpu.vector_store %arg5[%c0_9, %c0_10, %c0_11], %14 {strides = array<i32>} : memref<1x1x128xf32, #tpu.memory_space<vmem>>, vector<1x1x128xf32>,
    %c0_i32_12 = arith.constant 0 : i32
    %15 = arith.cmpi eq, %arg1, %c0_i32_12 : i32
    %16 = arith.extui %15 : i1 to i32
    %c0_i32_13 = arith.constant 0 : i32
    %17 = arith.cmpi ne, %16, %c0_i32_13 : i32
    scf.if %17 {
      %c0_14 = arith.constant 0 : index
      %c0_15 = arith.constant 0 : index
      %c0_16 = arith.constant 0 : index
      %18 = vector.load %arg5[%c0_14, %c0_15, %c0_16] : memref<1x1x128xf32, #tpu.memory_space<vmem>>, vector<1x1x128xf32>
      %19 = vector.shape_cast %18 : vector<1x1x128xf32> to vector<1x128xf32>
      %cst_17 = arith.constant 1.562500e-02 : f32
      %20 = vector.broadcast %cst_17 : f32 to vector<1x128xf32>
      %21 = arith.mulf %19, %20 : vector<1x128xf32>
      %c0_18 = arith.constant 0 : index
      %c0_19 = arith.constant 0 : index
      %22 = vector.load %arg4[%c0_18, %c0_19] : memref<1x128xf32, #tpu.memory_space<vmem>>, vector<1x128xf32>
      %23 = arith.addf %21, %22 : vector<1x128xf32>
      %c0_20 = arith.constant 0 : index
      %c0_21 = arith.constant 0 : index
      %c0_22 = arith.constant 0 : index
      %24 = vector.load %arg5[%c0_20, %c0_21, %c0_22] : memref<1x1x128xf32, #tpu.memory_space<vmem>>, vector<1x1x128xf32>
      %25 = vector.shape_cast %24 : vector<1x1x128xf32> to vector<1x128xf32>
      %26 = vector.shape_cast %23 : vector<1x128xf32> to vector<1x1x128xf32>
      tpu.vector_store %arg5[%c0_20, %c0_21, %c0_22], %26 {strides = array<i32>} : memref<1x1x128xf32, #tpu.memory_space<vmem>>, vector<1x1x128xf32>,
    } else {
    }
    return
  }
  func.func @transform_0(%arg0: i32, %arg1: i32) -> (i32, i32, i32) {
    %c0_i32 = arith.constant 0 : i32
    %c0_i32_0 = arith.constant 0 : i32
    return %arg0, %arg1, %c0_i32 : i32, i32, i32
  }
  func.func @transform_1(%arg0: i32, %arg1: i32) -> (i32, i32) {
    %c0_i32 = arith.constant 0 : i32
    %c0_i32_0 = arith.constant 0 : i32
    %c0_i32_1 = arith.constant 0 : i32
    return %c0_i32, %c0_i32_0 : i32, i32
  }
  func.func @transform_2(%arg0: i32, %arg1: i32) -> (i32, i32) {
    %c0_i32 = arith.constant 0 : i32
    %c0_i32_0 = arith.constant 0 : i32
    %c0_i32_1 = arith.constant 0 : i32
    return %c0_i32, %c0_i32_0 : i32, i32
  }
  func.func @transform_3(%arg0: i32, %arg1: i32) -> (i32, i32, i32) {
    %c0_i32 = arith.constant 0 : i32
    %c0_i32_0 = arith.constant 0 : i32
    %c0_i32_1 = arith.constant 0 : i32
    return %arg0, %c0_i32, %c0_i32_0 : i32, i32, i32
  }
}

module attributes {stable_mosaic.version = 11 : i64} {
  func.func @_head_kernel(%arg0: i32, %arg1: memref<2x128xf32, #tpu.memory_space<vmem>>, %arg2: memref<128x384xbf16, #tpu.memory_space<vmem>>, %arg3: memref<1x384xf32, #tpu.memory_space<vmem>>, %arg4: memref<128x128xbf16, #tpu.memory_space<vmem>>, %arg5: memref<128x128xbf16, #tpu.memory_space<vmem>>, %arg6: memref<1x128xf32, #tpu.memory_space<vmem>>, %arg7: memref<2x128xf32, #tpu.memory_space<vmem>>) attributes {dimension_semantics = [#tpu.dimension_semantics<arbitrary>], iteration_bounds = array<i64: 1>, scalar_prefetch = 0 : i64, scratch_operands = 0 : i64, tpu.core_type = #tpu.core_type<tc>, window_params = [{pipeline_mode = #tpu.pipeline_mode<synchronous>, transform_indices = @transform_0, window_bounds = array<i64: 2, 128>}, {pipeline_mode = #tpu.pipeline_mode<synchronous>, transform_indices = @transform_1, window_bounds = array<i64: 128, 384>}, {pipeline_mode = #tpu.pipeline_mode<synchronous>, transform_indices = @transform_2, window_bounds = array<i64: 1, 384>}, {pipeline_mode = #tpu.pipeline_mode<synchronous>, transform_indices = @transform_3, window_bounds = array<i64: 128, 128>}, {pipeline_mode = #tpu.pipeline_mode<synchronous>, transform_indices = @transform_4, window_bounds = array<i64: 128, 128>}, {pipeline_mode = #tpu.pipeline_mode<synchronous>, transform_indices = @transform_5, window_bounds = array<i64: 1, 128>}, {pipeline_mode = #tpu.pipeline_mode<synchronous>, transform_indices = @transform_6, window_bounds = array<i64: 2, 128>}]} {
    %c0 = arith.constant 0 : index
    %c0_0 = arith.constant 0 : index
    %0 = vector.load %arg1[%c0, %c0_0] : memref<2x128xf32, #tpu.memory_space<vmem>>, vector<2x128xf32>
    %1 = arith.truncf %0 : vector<2x128xf32> to vector<2x128xbf16>
    %c0_1 = arith.constant 0 : index
    %c0_2 = arith.constant 0 : index
    %2 = vector.load %arg2[%c0_1, %c0_2] : memref<128x384xbf16, #tpu.memory_space<vmem>>, vector<128x384xbf16>
    %cst = arith.constant dense<0.000000e+00> : vector<2x384xf32>
    %3 = tpu.matmul %1, %2, %cst {dimension_numbers = #tpu.dot_dimension_numbers<[1], [0], [0], [1], [0, 0, 1, 1], [], []>} : vector<2x128xbf16>, vector<128x384xbf16>, vector<2x384xf32> -> vector<2x384xf32>
    %c0_3 = arith.constant 0 : index
    %c0_4 = arith.constant 0 : index
    %4 = vector.load %arg3[%c0_3, %c0_4] : memref<1x384xf32, #tpu.memory_space<vmem>>, vector<1x384xf32>
    %5 = vector.broadcast %4 : vector<1x384xf32> to vector<2x384xf32>
    %6 = arith.addf %3, %5 : vector<2x384xf32>
    %7 = vector.extract_strided_slice %6 {offsets = [0, 0], sizes = [2, 128], strides = [1, 1]} : vector<2x384xf32> to vector<2x128xf32>
    %8 = vector.extract_strided_slice %6 {offsets = [0, 128], sizes = [2, 128], strides = [1, 1]} : vector<2x384xf32> to vector<2x128xf32>
    %9 = vector.extract_strided_slice %6 {offsets = [0, 256], sizes = [2, 128], strides = [1, 1]} : vector<2x384xf32> to vector<2x128xf32>
    %10 = arith.truncf %7 : vector<2x128xf32> to vector<2x128xbf16>
    %11 = arith.truncf %8 : vector<2x128xf32> to vector<2x128xbf16>
    %cst_5 = arith.constant dense<0.000000e+00> : vector<2x2xf32>
    %12 = tpu.matmul %10, %11, %cst_5 {dimension_numbers = #tpu.dot_dimension_numbers<[1], [1], [0], [0], [0, 0, 1, 0], [], []>} : vector<2x128xbf16>, vector<2x128xbf16>, vector<2x2xf32> -> vector<2x2xf32>
    %cst_6 = arith.constant 0.0883883461 : f32
    %13 = vector.broadcast %cst_6 : f32 to vector<2x2xf32>
    %14 = arith.mulf %12, %13 : vector<2x2xf32>
    %cst_7 = arith.constant dense<0xFF800000> : vector<2xf32>
    %15 = vector.multi_reduction <maximumf>, %14, %cst_7 [1] : vector<2x2xf32> to vector<2xf32>
    %16 = vector.shape_cast %15 : vector<2xf32> to vector<2x1xf32>
    %17 = vector.broadcast %16 : vector<2x1xf32> to vector<2x2xf32>
    %18 = arith.subf %14, %17 : vector<2x2xf32>
    %19 = math.exp %18 : vector<2x2xf32>
    %cst_8 = arith.constant dense<0.000000e+00> : vector<2xf32>
    %20 = vector.multi_reduction <add>, %19, %cst_8 [1] : vector<2x2xf32> to vector<2xf32>
    %21 = vector.shape_cast %20 : vector<2xf32> to vector<2x1xf32>
    %22 = tpu.reciprocal %21 {approx = true} : vector<2x1xf32> -> vector<2x1xf32>
    %23 = vector.broadcast %22 : vector<2x1xf32> to vector<2x2xf32>
    %24 = arith.mulf %19, %23 : vector<2x2xf32>
    %25 = arith.truncf %24 : vector<2x2xf32> to vector<2x2xbf16>
    %26 = arith.truncf %9 : vector<2x128xf32> to vector<2x128xbf16>
    %cst_9 = arith.constant dense<0.000000e+00> : vector<2x128xf32>
    %27 = tpu.matmul %25, %26, %cst_9 {dimension_numbers = #tpu.dot_dimension_numbers<[1], [0], [0], [1], [0, 0, 1, 1], [], []>} : vector<2x2xbf16>, vector<2x128xbf16>, vector<2x128xf32> -> vector<2x128xf32>
    %c0_10 = arith.constant 0 : index
    %c0_11 = arith.constant 0 : index
    %28 = vector.load %arg4[%c0_10, %c0_11] : memref<128x128xbf16, #tpu.memory_space<vmem>>, vector<128x128xbf16>
    %cst_12 = arith.constant dense<0.000000e+00> : vector<2x128xf32>
    %29 = tpu.matmul %1, %28, %cst_12 {dimension_numbers = #tpu.dot_dimension_numbers<[1], [0], [0], [1], [0, 0, 1, 1], [], []>} : vector<2x128xbf16>, vector<128x128xbf16>, vector<2x128xf32> -> vector<2x128xf32>
    %30 = arith.truncf %27 : vector<2x128xf32> to vector<2x128xbf16>
    %c0_13 = arith.constant 0 : index
    %c0_14 = arith.constant 0 : index
    %31 = vector.load %arg5[%c0_13, %c0_14] : memref<128x128xbf16, #tpu.memory_space<vmem>>, vector<128x128xbf16>
    %cst_15 = arith.constant dense<0.000000e+00> : vector<2x128xf32>
    %32 = tpu.matmul %30, %31, %cst_15 {dimension_numbers = #tpu.dot_dimension_numbers<[1], [0], [0], [1], [0, 0, 1, 1], [], []>} : vector<2x128xbf16>, vector<128x128xbf16>, vector<2x128xf32> -> vector<2x128xf32>
    %33 = arith.addf %29, %32 : vector<2x128xf32>
    %c0_16 = arith.constant 0 : index
    %c0_17 = arith.constant 0 : index
    %34 = vector.load %arg6[%c0_16, %c0_17] : memref<1x128xf32, #tpu.memory_space<vmem>>, vector<1x128xf32>
    %35 = vector.broadcast %34 : vector<1x128xf32> to vector<2x128xf32>
    %36 = arith.addf %33, %35 : vector<2x128xf32>
    %c0_18 = arith.constant 0 : index
    %c0_19 = arith.constant 0 : index
    %37 = vector.load %arg7[%c0_18, %c0_19] : memref<2x128xf32, #tpu.memory_space<vmem>>, vector<2x128xf32>
    tpu.vector_store %arg7[%c0_18, %c0_19], %36 {strides = array<i32>} : memref<2x128xf32, #tpu.memory_space<vmem>>, vector<2x128xf32>,
    return
  }
  func.func @transform_0(%arg0: i32) -> (i32, i32) {
    %c0_i32 = arith.constant 0 : i32
    %c0_i32_0 = arith.constant 0 : i32
    %c0_i32_1 = arith.constant 0 : i32
    return %c0_i32, %c0_i32_0 : i32, i32
  }
  func.func @transform_1(%arg0: i32) -> (i32, i32) {
    %c0_i32 = arith.constant 0 : i32
    %c0_i32_0 = arith.constant 0 : i32
    %c0_i32_1 = arith.constant 0 : i32
    return %c0_i32, %c0_i32_0 : i32, i32
  }
  func.func @transform_2(%arg0: i32) -> (i32, i32) {
    %c0_i32 = arith.constant 0 : i32
    %c0_i32_0 = arith.constant 0 : i32
    %c0_i32_1 = arith.constant 0 : i32
    return %c0_i32, %c0_i32_0 : i32, i32
  }
  func.func @transform_3(%arg0: i32) -> (i32, i32) {
    %c0_i32 = arith.constant 0 : i32
    %c0_i32_0 = arith.constant 0 : i32
    %c0_i32_1 = arith.constant 0 : i32
    return %c0_i32, %c0_i32_0 : i32, i32
  }
  func.func @transform_4(%arg0: i32) -> (i32, i32) {
    %c0_i32 = arith.constant 0 : i32
    %c0_i32_0 = arith.constant 0 : i32
    %c0_i32_1 = arith.constant 0 : i32
    return %c0_i32, %c0_i32_0 : i32, i32
  }
  func.func @transform_5(%arg0: i32) -> (i32, i32) {
    %c0_i32 = arith.constant 0 : i32
    %c0_i32_0 = arith.constant 0 : i32
    %c0_i32_1 = arith.constant 0 : i32
    return %c0_i32, %c0_i32_0 : i32, i32
  }
  func.func @transform_6(%arg0: i32) -> (i32, i32) {
    %c0_i32 = arith.constant 0 : i32
    %c0_i32_0 = arith.constant 0 : i32
    %c0_i32_1 = arith.constant 0 : i32
    return %c0_i32, %c0_i32_0 : i32, i32
  }
}

</mosaic_0001>

<bundles_post_ra>
// kernel: custom_xception_forward.2
= control target key start
LH: loop header
LB: loop body
LE: loop exit
PB: predicated region body
PF: predicated region fallthrough
CT: control target
= control target key end

     0   :  { %s876_s12 = smov 0   ;;  %s878_s13 = smov 0   ;;  %s995_s0 = inlined_call_operand.vmem [shape: bf16[2,64,288], index: 0, kind: input, shape index: {}]   ;;  %s996_s1 = inlined_call_operand.vmem [shape: bf16[288,128], index: 1, kind: input, shape index: {}]   ;;  %s997_s2 = inlined_call_operand.vmem [shape: f32[1,128], index: 2, kind: input, shape index: {}]   ;;  %s998_s3 = inlined_call_operand.vmem [shape: f32[2,1,128], index: 3, kind: output, shape index: {}]  }
   0x1   :  { %s880_s14 = smov 0  }
   0x2 LB: > { %s25_s15 = sadd.s32 1, %s849_s13  ;;  %p659_p0 = scmp.ge.s32.totalorder %s853_s14, 1  ;;  %s853_s14 = sphi %s880_s14, %s13_s14   ;;  %s849_s13 = sphi %s878_s13, %s1000_s13   ;;  %s845_s12 = sphi %s876_s12, %s999_s12  }
   0x3   : > { %p27_p1 = scmp.ge.s32.totalorder %s25_s15, 2  ;;  %p157_p2 = scmp.lt.s32.totalorder %s853_s14, 3 }
   0x5   : > { %s1002_s15 = smov (%p27_p1, %s25_s15), 0  ;;  %p158_p3 = pnand %p659_p0, %p157_p2 }
   0x6   : > { %v797_v0 = vld [vmem:[%s996_s1 + $0x40] sm:$0xff] (!%p158_p3)   ;;  %v799_v2 = vld [vmem:[%s996_s1 + $0x48] sm:$0xff] (!%p158_p3)   ;;  %p185_p4 = scmp.lt.s32.totalorder (!%p158_p3), %s845_s12, 1  ;;  %v801_v4 = vld [vmem:[%s996_s1 + $0x50] sm:$0xff] (!%p158_p3)   ;;  %vm424_vm0 = vcmask (!%p158_p3), 261120   ;;  %v855_v30 = vmov (!%p158_p3), 0.0  }
   0x7   : > { %161 = sbr.rel (%p158_p3) target bundleno = 307 (0x133), region = 32  ;;  %v798_v1 = vld [vmem:[%s996_s1] sm:$0xff] (!%p158_p3)   ;;  %697 = vmatprep.subr.bf16.mxu0 (!%p158_p3), %v797_v0  ;;  %755 = vmatprep.subr.bf16.mxu1 (!%p158_p3), %v797_v0  ;;  %v800_v3 = vld [vmem:[%s996_s1 + $0x8] sm:$0xff] (!%p158_p3)   ;;  %v802_v5 = vld [vmem:[%s996_s1 + $0x10] sm:$0xff] (!%p158_p3)  }
   0x8   : > { %698 = vmatpush3.bf16.msra.mxu0 (!%p158_p3), %v798_v1  ;;  %763 = vmatpush3.bf16.msra.mxu1 (!%p158_p3), %v798_v1  ;;  %v803_v6 = vld [vmem:[%s996_s1 + $0x58] sm:$0xff] (!%p158_p3)   ;;  %v805_v8 = vld [vmem:[%s996_s1 + $0x60] sm:$0xff] (!%p158_p3)   ;;  %v807_v10 = vld [vmem:[%s996_s1 + $0x68] sm:$0xff] (!%p158_p3)  }
   0x9   : > { %699 = vmatprep.subr.bf16.mxu0 (!%p158_p3), %v799_v2  ;;  %756 = vmatprep.subr.bf16.mxu1 (!%p158_p3), %v799_v2  ;;  %v804_v7 = vld [vmem:[%s996_s1 + $0x18] sm:$0xff] (!%p158_p3)   ;;  %v806_v9 = vld [vmem:[%s996_s1 + $0x20] sm:$0xff] (!%p158_p3)   ;;  %v808_v13 = vld [vmem:[%s996_s1 + $0x28] sm:$0xff] (!%p158_p3)  }
   0xa   : > { %v809_v14 = vld [vmem:[%s996_s1 + $0x70] sm:$0xff] (!%p158_p3)   ;;  %v811_v16 = vld [vmem:[%s996_s1 + $0x78] sm:$0xff] (!%p158_p3)   ;;  %v819_v18 = vld [vmem:[%s996_s1 + $0x80] sm:$0xff] (!%p158_p3)  }
   0xb   : > { %v810_v15 = vld [vmem:[%s996_s1 + $0x30] sm:$0xff] (!%p158_p3)   ;;  %v812_v17 = vld [vmem:[%s996_s1 + $0x38] sm:$0xff] (!%p158_p3)   ;;  %v820_v22 = vld [vmem:[%s996_s1 + $0x88] sm:$0xff] (!%p158_p3)  }
   0xc   : > { %700 = vmatpush3.bf16.msra.mxu0 (!%p158_p3), %v800_v3  ;;  %764 = vmatpush3.bf16.msra.mxu1 (!%p158_p3), %v800_v3 }
   0xd   : > { %701 = vmatprep.subr.bf16.mxu0 (!%p158_p3), %v801_v4  ;;  %757 = vmatprep.subr.bf16.mxu1 (!%p158_p3), %v801_v4 }
   0xe   : > { %s1004_s12 = smov (!%p185_p4, %s845_s12), 1 }
   0xf   : > { %s771_s30 = smul.u32 96, %s1004_s12  ;;  %s976_s8 = scalar_lea.vmem %s998_s3, %s1004_s12 }
  0x10   : > { %702 = vmatpush3.bf16.msra.mxu0 %v802_v5  ;;  %765 = vmatpush3.bf16.msra.mxu1 %v802_v5  ;;  %203 = vst [vmem:[%s976_s8] sm:$0x1] %v855_v30 }
  0x11   : > { %703 = vmatprep.subr.bf16.mxu0 %v803_v6  ;;  %758 = vmatprep.subr.bf16.mxu1 %v803_v6  ;;  %s927_s10 = scalar_lea.vmem %s995_s0, %s771_s30 }
  0x12   : > { %v815_v11 = vld [vmem:[%s927_s10 + $0x4] ss:$12 sps:$4 sm:$0xff]   ;;  %v818_v12 = vld [vmem:[%s927_s10 + $0x4c] ss:$12 sps:$4 sm:$0xff]   ;;  %v816_v20 = vld [vmem:[%s927_s10 + $0x48] ss:$12 sps:$4 sm:$0xff]  }
  0x13   : > { %469 = vmatprep.mubr.bf16.mxu0 %v815_v11  ;;  %493 = vmatprep.mubr.bf16.mxu1 %v818_v12  ;;  %v813_v19 = vld [vmem:[%s927_s10] ss:$12 sps:$4 sm:$0xff]   ;;  %v821_v21 = vld [vmem:[%s927_s10 + $0x1c] ss:$12 sps:$4 sm:$0xff]   ;;  %v824_v24 = vld [vmem:[%s927_s10 + $0x18] ss:$12 sps:$4 sm:$0xff]  }
  0x14   : > { %704 = vmatpush3.bf16.msra.mxu0 %v804_v7  ;;  %766 = vmatpush3.bf16.msra.mxu1 %v804_v7  ;;  %v823_v23 = vld [vmem:[%s927_s10 + $0x8] ss:$12 sps:$4 sm:$0xff]   ;;  %v825_v25 = vld [vmem:[%s927_s10 + $0x20] ss:$12 sps:$4 sm:$0xff]   ;;  %v828_v27 = vld [vmem:[%s927_s10 + $0x38] ss:$12 sps:$4 sm:$0xff]  }
  0x15   : > { %705 = vmatprep.subr.bf16.mxu0 %v805_v8  ;;  %759 = vmatprep.subr.bf16.mxu1 %v805_v8  ;;  %v826_v26 = vld [vmem:[%s927_s10 + $0x34] ss:$12 sps:$4 sm:$0xff]   ;;  %v829_v28 = vld [vmem:[%s927_s10 + $0x30] ss:$12 sps:$4 sm:$0xff]  }
  0x16   : > { %v830_v29 = vld [vmem:[%s927_s10 + $0x50] ss:$12 sps:$4 sm:$0xff]  }
  0x18   : > { %706 = vmatpush3.bf16.msra.mxu0 %v806_v9  ;;  %767 = vmatpush3.bf16.msra.mxu1 %v806_v9 }
  0x19   : > { %707 = vmatprep.subr.bf16.mxu0 %v807_v10  ;;  %760 = vmatprep.subr.bf16.mxu1 %v807_v10 }
  0x1c   : > { %708 = vmatpush3.bf16.msra.mxu0 %v808_v13  ;;  %768 = vmatpush3.bf16.msra.mxu1 %v808_v13 }
  0x1d   : > { %709 = vmatprep.subr.bf16.mxu0 %v809_v14  ;;  %761 = vmatprep.subr.bf16.mxu1 %v809_v14 }
  0x20   : > { %710 = vmatpush3.bf16.msra.mxu0 %v810_v15  ;;  %769 = vmatpush3.bf16.msra.mxu1 %v810_v15 }
  0x21   : > { %711 = vmatprep.subr.bf16.mxu0 %v811_v16  ;;  %762 = vmatprep.subr.bf16.mxu1 %v811_v16 }
  0x24   : > { %712 = vmatpush3.bf16.msra.mxu0 %v812_v17  ;;  %770 = vmatpush3.bf16.msra.mxu1 %v812_v17 }
  0x25   : > { %743 = vmatprep.subr.bf16.mxu1 %v819_v18 }
  0x27   : > { %470 = vmatmul.mubr.bf16.vlgmr.msra.gmra.mrb[0].mxu0 %v813_v19  ;;  %494 = vmatmul.mubr.bf16.vlgmr.msra.gmra.mrb[0].mxu1 %v816_v20  ;;  %v567_v19 = vld [vmem:[%s976_s8] sm:$0x1] }
  0x28   : > { %744 = vmatpush3.bf16.msra.mxu1 %v819_v18  ;;  %477 = vmatprep.mubr.bf16.mxu0 %v821_v21 }
  0x29   : > { %745 = vmatprep.subr.bf16.mxu1 %v820_v22  ;;  %747 = vmatprep.mubr.msk.bf16.mxu1 %vm424_vm0, %v823_v23  ;;  %v588_v23 = vld [vmem:[%s997_s2] sm:$0x1] }
  0x2c   : > { %746 = vmatpush3.bf16.msra.mxu1 %v820_v22 }
  0x2f   : > { %478 = vmatmul.mubr.bf16.gmra.mrb[4].mxu0 %v824_v24  ;;  %748 = vmatmul.mubr.msk.bf16.vlgmr.msra.gmra.mrb[4].mxu1 %vm424_vm0, %v825_v25 }
  0x30   : > { %485 = vmatprep.mubr.bf16.mxu0 %v826_v26  ;;  %751 = vmatprep.mubr.msk.bf16.mxu1 %vm424_vm0, %v828_v27 }
  0x37   : > { %486 = vmatmul.mubr.bf16.gmra.mrb[8].mxu0 %v829_v28  ;;  %752 = vmatmul.mubr.msk.bf16.gmra.mrb[8].mxu1 %vm424_vm0, %v830_v29 }
  0xfa   : > { %v713_v31 = vpop.f32.mrb[0].mxu0  ;;  %v731_v32 = vpop.f32.mrb[0].mxu1 }
  0xfb   : > { %v714_v33 = vpop.f32.mrb[1].mxu0  ;;  %v732_v34 = vpop.f32.mrb[1].mxu1 }
  0xfc   : > { %v715_v35 = vadd.f32 %v714_v33, %v713_v31  ;;  %v733_v36 = vadd.f32 %v732_v34, %v731_v32  ;;  %v716_v37 = vpop.f32.mrb[2].mxu0  ;;  %v734_v38 = vpop.f32.mrb[2].mxu1 }
  0xfd   : > { %v717_v39 = vpop.f32.mrb[3].mxu0  ;;  %v735_v40 = vpop.f32.mrb[3].mxu1 }
  0xfe   : > { %v718_v41 = vadd.f32 %v717_v39, %v716_v37  ;;  %v736_v42 = vadd.f32 %v735_v40, %v734_v38 }
 0x102   : > { %v719_v43 = vpop.f32.mrb[4].mxu0  ;;  %v749_v44 = vpop.f32.mrb[4].mxu1 }
 0x103   : > { %v720_v45 = vpop.f32.mrb[5].mxu0  ;;  %v536_v46 = vpop.f32.mrb[5].mxu1 }
 0x104   : > { %v721_v47 = vadd.f32 %v720_v45, %v719_v43  ;;  %v537_v48 = vadd.f32 %v715_v35, %v536_v46  ;;  %v722_v49 = vpop.f32.mrb[6].mxu0  ;;  %v750_v50 = vpop.f32.mrb[6].mxu1 }
 0x105   : > { %v723_v51 = vpop.f32.mrb[7].mxu0  ;;  %v539_v52 = vpop.f32.mrb[7].mxu1 }
 0x106   : > { %v545_v53 = vadd.f32 %v749_v44, %v721_v47  ;;  %v724_v54 = vadd.f32 %v723_v51, %v722_v49  ;;  %v540_v55 = vadd.f32 %v718_v41, %v539_v52 }
 0x108   : > { %v548_v56 = vadd.f32 %v750_v50, %v724_v54  ;;  %v568_v57 = vadd.f32 %v540_v55, %v537_v48 }
 0x10a   : > { %v569_v58 = vadd.f32 %v568_v57, %v545_v53  ;;  %v725_v59 = vpop.f32.mrb[8].mxu0  ;;  %v753_v60 = vpop.f32.mrb[8].mxu1 }
 0x10b   : > { %v561_v61 = vadd.f32 %v753_v60, %v733_v36  ;;  %v726_v62 = vpop.f32.mrb[9].mxu0  ;;  %v552_v63 = vpop.f32.mrb[9].mxu1 }
 0x10c   : > { %v727_v0 = vadd.f32 %v726_v62, %v725_v59  ;;  %v570_v1 = vadd.f32 %v569_v58, %v548_v56  ;;  %v728_v2 = vpop.f32.mrb[10].mxu0  ;;  %v754_v3 = vpop.f32.mrb[10].mxu1 }
 0x10d   : > { %v564_v4 = vadd.f32 %v754_v3, %v736_v42  ;;  %v729_v5 = vpop.f32.mrb[11].mxu0  ;;  %v555_v6 = vpop.f32.mrb[11].mxu1 }
 0x10e   : > { %v553_v7 = vadd.f32 %v727_v0, %v552_v63  ;;  %v730_v8 = vadd.f32 %v729_v5, %v728_v2 }
 0x110   : > { %v571_v9 = vadd.f32 %v570_v1, %v553_v7  ;;  %v556_v10 = vadd.f32 %v730_v8, %v555_v6 }
 0x112   : > { %v572_v11 = vadd.f32 %v571_v9, %v556_v10 }
 0x114   : > { %v573_v12 = vadd.f32 %v572_v11, %v561_v61 }
 0x116   : > { %v574_v13 = vadd.f32 %v573_v12, %v564_v4 }
 0x118   : > { %v575_v14 = vrot.slane %v574_v13, 4 }
 0x11a   : > { %v576_v15 = vadd.f32 %v575_v14, %v574_v13 }
 0x11c   : > { %v577_v16 = vrot.slane %v576_v15, 2 }
 0x11e   : > { %v578_v17 = vadd.f32 %v577_v16, %v576_v15 }
 0x120   : > { %v579_v18 = vrot.slane %v578_v17, 1 }
 0x122   : > { %v580_v20 = vadd.f32 %v579_v18, %v578_v17 }
 0x124   : > { %v581_v21 = vadd.f32 %v580_v20, %v567_v19 }
 0x126   : > { %582 = vst [vmem:[%s976_s8] sm:$0x1] %v581_v21 }
 0x12d   : > { %v586_v22 = vld [vmem:[%s976_s8] sm:$0x1] }
 0x12e   : > { %v587_v24 = vmul.f32 0.015625, %v586_v22 }
 0x130   : > { %v589_v25 = vadd.f32 %v588_v23, %v587_v24 }
 0x132   : > { %590 = vst [vmem:[%s976_s8] sm:$0x1] %v589_v25 }
 0x133 PF: > { %s13_s14 = sadd.s32 1, %s853_s14   ;;  %s999_s12 = smov %s849_s13 }
 0x134   : > { %p10_p5 = scmp.ge.s32.totalorder %s13_s14, 4   ;;  %s1000_s13 = smov %s1002_s15 }
 0x136   :  { %12 = sbr.rel (!%p10_p5) target bundleno = 2 (0x2), region = 70 }

// kernel: custom_xception_forward.3
= control target key start
LH: loop header
LB: loop body
LE: loop exit
PB: predicated region body
PF: predicated region fallthrough
CT: control target
= control target key end

     0   :  { %v847_v2 = vmov 0   ;;  %s1070_s0 = inlined_call_operand.vmem [shape: f32[2,128], index: 0, kind: input, shape index: {}]   ;;  %s1071_s1 = inlined_call_operand.vmem [shape: bf16[128,384], index: 1, kind: input, shape index: {}]   ;;  %s1072_s2 = inlined_call_operand.vmem [shape: f32[1,384], index: 2, kind: input, shape index: {}]   ;;  %s1073_s3 = inlined_call_operand.vmem [shape: bf16[128,128], index: 3, kind: input, shape index: {}]   ;;  %s1074_s4 = inlined_call_operand.vmem [shape: bf16[128,128], index: 4, kind: input, shape index: {}]   ;;  %s1075_s5 = inlined_call_operand.vmem [shape: f32[1,128], index: 5, kind: input, shape index: {}]   ;;  %s1076_s6 = inlined_call_operand.hbm [shape: f32[2,128], index: 6, kind: output, shape index: {}]  }
   0x1   :  { %v771_v0 = vld [vmem:[%s1071_s1 + $0x4] ss:$12 sps:$4 sm:$0xff]   ;;  %v773_v1 = vld [vmem:[%s1071_s1] ss:$12 sps:$4 sm:$0xff]   ;;  %236 = vmatprep.mubr.bf16.mxu0 %v847_v2  ;;  %v774_v3 = vld [vmem:[%s1071_s1 + $0x1c] ss:$12 sps:$4 sm:$0xff]  }
   0x2   :  { %204 = vmatprep.subr.bf16.mxu0 %v771_v0  ;;  %v776_v4 = vld [vmem:[%s1071_s1 + $0x18] ss:$12 sps:$4 sm:$0xff]   ;;  %v777_v5 = vld [vmem:[%s1071_s1 + $0x34] ss:$12 sps:$4 sm:$0xff]   ;;  %v779_v6 = vld [vmem:[%s1071_s1 + $0x30] ss:$12 sps:$4 sm:$0xff]  }
   0x3   :  { %205 = vmatpush1.bf16.msra.mxu0 %v773_v1  ;;  %v780_v7 = vld [vmem:[%s1071_s1 + $0x4c] ss:$12 sps:$4 sm:$0xff]   ;;  %v782_v8 = vld [vmem:[%s1071_s1 + $0x48] ss:$12 sps:$4 sm:$0xff]   ;;  %v783_v9 = vld [vmem:[%s1071_s1 + $0x64] ss:$12 sps:$4 sm:$0xff]  }
   0x4   :  { %206 = vmatprep.subr.bf16.mxu0 %v774_v3  ;;  %v785_v10 = vld [vmem:[%s1071_s1 + $0x60] ss:$12 sps:$4 sm:$0xff]   ;;  %v786_v11 = vld [vmem:[%s1071_s1 + $0x7c] ss:$12 sps:$4 sm:$0xff]   ;;  %v788_v12 = vld [vmem:[%s1071_s1 + $0x78] ss:$12 sps:$4 sm:$0xff]  }
   0x5   :  { %v789_v13 = vld [vmem:[%s1071_s1 + $0x94] ss:$12 sps:$4 sm:$0xff]   ;;  %v791_v14 = vld [vmem:[%s1071_s1 + $0x90] ss:$12 sps:$4 sm:$0xff]   ;;  %v792_v15 = vld [vmem:[%s1071_s1 + $0xac] ss:$12 sps:$4 sm:$0xff]  }
   0x6   :  { %v794_v16 = vld [vmem:[%s1071_s1 + $0xa8] ss:$12 sps:$4 sm:$0xff]   ;;  %v25_v17 = vld [vmem:[%s1070_s0] sm:$0x3] }
   0x7   :  { %207 = vmatpush1.bf16.msra.mxu0 %v776_v4 }
   0x8   :  { %208 = vmatprep.subr.bf16.mxu0 %v777_v5 }
   0xb   :  { %209 = vmatpush1.bf16.msra.mxu0 %v779_v6 }
   0xc   :  { %210 = vmatprep.subr.bf16.mxu0 %v780_v7 }
   0xf   :  { %211 = vmatpush1.bf16.msra.mxu0 %v782_v8 }
  0x10   :  { %212 = vmatprep.subr.bf16.mxu0 %v783_v9 }
  0x13   :  { %213 = vmatpush1.bf16.msra.mxu0 %v785_v10 }
  0x14   :  { %214 = vmatprep.subr.bf16.mxu0 %v786_v11 }
  0x17   :  { %215 = vmatpush1.bf16.msra.mxu0 %v788_v12 }
  0x18   :  { %216 = vmatprep.subr.bf16.mxu0 %v789_v13 }
  0x1b   :  { %217 = vmatpush1.bf16.msra.mxu0 %v791_v14 }
  0x1c   :  { %11 = vsyncpa [#allocation3], 0  ;;  %218 = vmatprep.subr.bf16.mxu0 %v792_v15  ;;  %v937_v18 = vpack.c.bf16 %v25_v17, %v25_v17  ;;  %v848_v19 = vmov 0.0   ;;  %vm849_vm0 = vmmov 0   ;;  %v61_v20 = vlaneseq  ;;  %v59_v23 = vld [vmem:[%s1072_s2] sm:$0x7] }
  0x1d   :  { %695 = vmatprep.subr.bf16.mxu1 %v848_v19  ;;  %711 = vmatprep.mubr.msk.bf16.mxu1 %vm849_vm0, %v848_v19  ;;  %v795_v35 = vld [vmem:[%s1071_s1 + $0x8] ss:$12 sps:$4 sm:$0xff]   ;;  %v796_v36 = vld [vmem:[%s1071_s1 + $0x20] ss:$12 sps:$4 sm:$0xff]   ;;  %v797_v37 = vld [vmem:[%s1071_s1 + $0x38] ss:$12 sps:$4 sm:$0xff]  }
  0x1e   :  { %v62_v21 = vshrl.u32 %v61_v20, 7  ;;  %696 = vmatpush3.bf16.msra.mxu1 %v795_v35  ;;  %v798_v38 = vld [vmem:[%s1071_s1 + $0x50] ss:$12 sps:$4 sm:$0xff]   ;;  %v799_v39 = vld [vmem:[%s1071_s1 + $0x68] ss:$12 sps:$4 sm:$0xff]   ;;  %vm328_vm1 = vcmask 9216  }
  0x1f   :  { %219 = vmatpush1.bf16.msra.mxu0 %v794_v16  ;;  %697 = vmatprep.subr.bf16.mxu1 %v848_v19  ;;  %v800_v40 = vld [vmem:[%s1071_s1 + $0x80] ss:$12 sps:$4 sm:$0xff]   ;;  %v801_v41 = vld [vmem:[%s1071_s1 + $0x98] ss:$12 sps:$4 sm:$0xff]   ;;  %v802_v42 = vld [vmem:[%s1071_s1 + $0xb0] ss:$12 sps:$4 sm:$0xff]  }
  0x20   :  { %715 = vmatprep.subr.bf16.mxu0 %v848_v19  ;;  %v67_v22 = vsub.s32 1, %v62_v21  ;;  %v63_v25 = vsub.s32 0, %v62_v21  ;;  %v71_v49 = vsub.s32 2, %v62_v21  ;;  %vm346_vm2 = vcmask 1040384   ;;  %v804_v63 = vld [vmem:[%s1074_s4] sm:$0xff]   ;;  %v806_v0 = vld [vmem:[%s1074_s4 + $0x8] sm:$0xff]  }
  0x21   :  { %v808_v1 = vld [vmem:[%s1074_s4 + $0x10] sm:$0xff]   ;;  %v810_v2 = vld [vmem:[%s1074_s4 + $0x18] sm:$0xff]   ;;  %v812_v3 = vld [vmem:[%s1074_s4 + $0x20] sm:$0xff]   ;;  %vm342_vm3 = vcmask 15360   ;;  %s850_s28 = smov [#allocation2]  }
  0x22   :  { %237 = vmatmul.mubr.bf16.vlgmr.msra.gmra.mrb[0].mxu0 %v937_v18  ;;  %v68_v24 = vrot.slane %v59_v23, %v67_v22  ;;  %v64_v30 = vrot.slane %v59_v23, %v63_v25  ;;  %698 = vmatpush3.bf16.msra.mxu1 %v796_v36  ;;  %v72_v50 = vrot.slane %v59_v23, %v71_v49  ;;  %v814_v4 = vld [vmem:[%s1074_s4 + $0x28] sm:$0xff]   ;;  %v816_v5 = vld [vmem:[%s1074_s4 + $0x30] sm:$0xff]   ;;  %v803_v9 = vld [vmem:[%s1073_s3] sm:$0xff]   ;;  %s614_s29 = sshll.u32 %s850_s28, 4  ;;  %s615_s29 = int_to_ptr.vmem [resolvable:$true] %s614_s29 }
  0x23   :  { %717 = vmatprep.mubr.msk.bf16.mxu0 %vm849_vm0, %v848_v19  ;;  %699 = vmatprep.subr.bf16.mxu1 %v848_v19  ;;  %v805_v11 = vld [vmem:[%s1073_s3 + $0x8] sm:$0xff]   ;;  %v807_v12 = vld [vmem:[%s1073_s3 + $0x10] sm:$0xff]   ;;  %v809_v13 = vld [vmem:[%s1073_s3 + $0x18] sm:$0xff]   ;;  %p828_p1 = scmp.lt.s32.totalorder %s615_s29, %s615_s29 }
  0x24   :  { %v811_v14 = vld [vmem:[%s1073_s3 + $0x20] sm:$0xff]   ;;  %v813_v15 = vld [vmem:[%s1073_s3 + $0x28] sm:$0xff]   ;;  %v815_v16 = vld [vmem:[%s1073_s3 + $0x30] sm:$0xff]  }
  0x25   :  { %v817_v17 = vld [vmem:[%s1073_s3 + $0x38] sm:$0xff]  }
  0x26   :  { %700 = vmatpush3.bf16.msra.mxu1 %v797_v37  ;;  %v818_v20 = vld [vmem:[%s1074_s4 + $0x38] sm:$0xff]   ;;  %s823_s4 = scalar_lea.vmem %s615_s29, 32 }
  0x27   :  { %701 = vmatprep.subr.bf16.mxu1 %v848_v19  ;;  %p824_p0 = scmp.ne.s32.totalorder %s615_s29, %s823_s4  ;;  %p829_p2 = scmp.lt.s32.totalorder %s823_s4, %s823_s4 }
  0x29   :  { %p830_p3 = por %p829_p2, %p828_p1 }
  0x2a   :  { %702 = vmatpush3.bf16.msra.mxu1 %v798_v38 }
  0x2b   :  { %703 = vmatprep.subr.bf16.mxu1 %v848_v19  ;;  %p831_p4 = pnand %p830_p3, %p824_p0 }
  0x2e   :  { %704 = vmatpush3.bf16.msra.mxu1 %v799_v39 }
  0x2f   :  { %705 = vmatprep.subr.bf16.mxu1 %v848_v19 }
  0x32   :  { %706 = vmatpush3.bf16.msra.mxu1 %v800_v40 }
  0x33   :  { %707 = vmatprep.subr.bf16.mxu1 %v848_v19 }
  0x36   :  { %708 = vmatpush3.bf16.msra.mxu1 %v801_v41 }
  0x37   :  { %709 = vmatprep.subr.bf16.mxu1 %v848_v19 }
  0x3a   :  { %710 = vmatpush3.bf16.msra.mxu1 %v802_v42 }
  0x3b   :  { %721 = vmatprep.subr.bf16.mxu1 %v848_v19 }
  0x3d   :  { %712 = vmatmul.mubr.bf16.vlgmr.msra.gmra.mrb[0].mxu1 %v937_v18 }
  0x3e   :  { %723 = vmatprep.mubr.msk.bf16.mxu1 %vm849_vm0, %v848_v19 }
  0xf5   :  { %v238_v26 = vpop.f32.mrb[0].mxu0 }
  0xf6   :  { %v240_v27 = vpop.f32.mrb[1].mxu0  ;;  %v239_v33 = vadd.f32 %v238_v26, %v64_v30 }
  0xf7   :  { %v241_v28 = vadd.f32 %v240_v27, %v68_v24  ;;  %v242_v29 = vpop.f32.mrb[2].mxu0 }
  0xf8   :  { %v243_v31 = vpop.f32.mrb[3].mxu0  ;;  %v285_v34 = vpack.c.bf16 %v239_v33, %v239_v33 }
  0xf9   :  { %v286_v32 = vpack.c.bf16 %v241_v28, %v241_v28 }
  0xfb   :  { %716 = vmatpush3.bf16.xpose.msra.mxu0 %v286_v32 }
  0xfc   :  { %727 = vmatprep.subr.bf16.mxu0 %v848_v19 }
 0x102   :  { %718 = vmatmul.mubr.bf16.vlgmr.msra.gmra.mrb[4].mxu0 %v285_v34 }
 0x103   :  { %743 = vmatprep.mubr.msk.bf16.mxu0 %vm849_vm0, %v848_v19  ;;  %728 = vmatpush3.bf16.msra.mxu0 %v804_v63 }
 0x104   :  { %729 = vmatprep.subr.bf16.mxu0 %v848_v19 }
 0x107   :  { %730 = vmatpush3.bf16.msra.mxu0 %v806_v0 }
 0x108   :  { %731 = vmatprep.subr.bf16.mxu0 %v848_v19 }
 0x10b   :  { %732 = vmatpush3.bf16.msra.mxu0 %v808_v1 }
 0x10c   :  { %733 = vmatprep.subr.bf16.mxu0 %v848_v19 }
 0x10f   :  { %734 = vmatpush3.bf16.msra.mxu0 %v810_v2 }
 0x110   :  { %v279_v51 = vpop.f32.mrb[0].mxu1  ;;  %735 = vmatprep.subr.bf16.mxu0 %v848_v19 }
 0x111   :  { %v280_v52 = vadd.f32 %v279_v51, %v72_v50  ;;  %v713_v53 = vpop.f32.mrb[1].mxu1 }
 0x112   :  { %v282_v54 = vpop.f32.mrb[2].mxu1 }
 0x113   :  { %v341_v55 = vpack.c.bf16 %v280_v52, %v280_v52  ;;  %v714_v56 = vpop.f32.mrb[3].mxu1  ;;  %736 = vmatpush3.bf16.msra.mxu0 %v812_v3 }
 0x114   :  { %737 = vmatprep.subr.bf16.mxu0 %v848_v19 }
 0x115   :  { %v348_v57 = vsel %vm346_vm2, %v341_v55, 0 }
 0x116   :  { %722 = vmatpush3.bf16.msra.mxu1 %v348_v57 }
 0x117   :  { %747 = vmatprep.subr.bf16.mxu1 %v848_v19  ;;  %738 = vmatpush3.bf16.msra.mxu0 %v814_v4 }
 0x118   :  { %739 = vmatprep.subr.bf16.mxu0 %v848_v19 }
 0x11b   :  { %740 = vmatpush3.bf16.msra.mxu0 %v816_v5 }
 0x11c   :  { %741 = vmatprep.subr.bf16.mxu0 %v848_v19 }
 0x11f   :  { %742 = vmatpush3.bf16.msra.mxu0 %v818_v20 }
 0x1d5   :  { %v321_v43 = vpop.f32.mrb[4].mxu0 }
 0x1d6   :  { %v327_v44 = vmul.f32 0.088388346, %v321_v43  ;;  %v719_v45 = vpop.f32.mrb[5].mxu0 }
 0x1d7   :  { %v324_v46 = vpop.f32.mrb[6].mxu0 }
 0x1d8   :  { %v720_v47 = vpop.f32.mrb[7].mxu0  ;;  %v329_v48 = vsel %vm328_vm1, %v327_v44, -inf }
 0x1d9   :  { %330 = vmax.xlane.f32.xlu0 %v329_v48 }
 0x266   :  { %v331_v58 = vpop.xlane.xlu0 %330 }
 0x267   :  { %v332_v59 = vsub.f32 %v327_v44, %v331_v58 }
 0x269   :  { %v333_v60 = vmul.f32 1.442695, %v332_v59 }
 0x26b   :  { %819 = vpow2.f32 %v333_v60 }
 0x275   :  { %v820_v61 = vpop.eup %819 }
 0x276   :  { %v335_v62 = vsel %vm328_vm1, %v820_v61, 0.0 }
 0x277   :  { %336 = vadd.xlane.f32.xlu0 %v335_v62 }
 0x304   :  { %v337_v6 = vpop.xlane.xlu0 %336 }
 0x305   :  { %821 = vrcp.f32 %v337_v6 }
 0x30f   :  { %v822_v7 = vpop.eup %821 }
 0x310   :  { %v339_v8 = vmul.f32 %v822_v7, %v820_v61 }
 0x312   :  { %v340_v10 = vpack.c.bf16 %v339_v8, %v339_v8 }
 0x314   :  { %724 = vmatmul.mubr.msk.bf16.vlgmr.msra.gmra.mrb[4].mxu1 %vm342_vm3, %v340_v10 }
 0x315   :  { %748 = vmatpush3.bf16.msra.mxu1 %v803_v9  ;;  %763 = vmatprep.mubr.msk.bf16.mxu1 %vm849_vm0, %v848_v19 }
 0x316   :  { %749 = vmatprep.subr.bf16.mxu1 %v848_v19 }
 0x319   :  { %750 = vmatpush3.bf16.msra.mxu1 %v805_v11 }
 0x31a   :  { %751 = vmatprep.subr.bf16.mxu1 %v848_v19 }
 0x31d   :  { %752 = vmatpush3.bf16.msra.mxu1 %v807_v12 }
 0x31e   :  { %753 = vmatprep.subr.bf16.mxu1 %v848_v19 }
 0x321   :  { %754 = vmatpush3.bf16.msra.mxu1 %v809_v13 }
 0x322   :  { %755 = vmatprep.subr.bf16.mxu1 %v848_v19 }
 0x325   :  { %756 = vmatpush3.bf16.msra.mxu1 %v811_v14 }
 0x326   :  { %757 = vmatprep.subr.bf16.mxu1 %v848_v19 }
 0x329   :  { %758 = vmatpush3.bf16.msra.mxu1 %v813_v15 }
 0x32a   :  { %759 = vmatprep.subr.bf16.mxu1 %v848_v19 }
 0x32d   :  { %760 = vmatpush3.bf16.msra.mxu1 %v815_v16 }
 0x32e   :  { %761 = vmatprep.subr.bf16.mxu1 %v848_v19 }
 0x331   :  { %762 = vmatpush3.bf16.msra.mxu1 %v817_v17 }
 0x334   :  { %764 = vmatmul.mubr.bf16.vlgmr.msra.gmra.mrb[8].mxu1 %v937_v18  ;;  %v663_v18 = vld [vmem:[%s1075_s5] ss:$0 sm:$0xff] }
 0x3e7   :  { %v384_v21 = vpop.f32.mrb[4].mxu1 }
 0x3e8   :  { %v406_v22 = vpack.c.bf16 %v384_v21, %v384_v21  ;;  %v725_v23 = vpop.f32.mrb[5].mxu1 }
 0x3e9   :  { %v387_v24 = vpop.f32.mrb[6].mxu1 }
 0x3ea   :  { %v726_v25 = vpop.f32.mrb[7].mxu1  ;;  %744 = vmatmul.mubr.bf16.vlgmr.msra.gmra.mrb[8].mxu0 %v406_v22 }
 0x407   :  { %v593_v26 = vpop.f32.mrb[8].mxu1 }
 0x408   :  { %v765_v27 = vpop.f32.mrb[9].mxu1 }
 0x409   :  { %v596_v28 = vpop.f32.mrb[10].mxu1 }
 0x40a   :  { %v766_v29 = vpop.f32.mrb[11].mxu1 }
 0x4bd   :  { %v505_v30 = vpop.f32.mrb[8].mxu0 }
 0x4be   :  { %v594_v19 = vadd.f32 %v593_v26, %v505_v30  ;;  %v745_v31 = vpop.f32.mrb[9].mxu0 }
 0x4bf   :  { %v508_v32 = vpop.f32.mrb[10].mxu0 }
 0x4c0   :  { %v746_v33 = vpop.f32.mrb[11].mxu0  ;;  %v606_v34 = vadd.f32 %v663_v18, %v594_v19 }
 0x4c2   :  { %607 = vst [vmem:[#allocation2] sm:$0x3] %v606_v34 }
 0x4c3   :  { %834 = shalt.err (!%p831_p4)
}
 0x4c4   :  { %s835_s5 = scalar_lea.hbm %s1076_s6, 32 }
 0x4c5   :  { %p836_p5 = scmp.ne.s32.totalorder %s1076_s6, %s835_s5  ;;  %p839_p6 = scmp.lt.u32.totalorder %s835_s5, %s1076_s6 }
 0x4c7   :  { %p841_p7 = pnand %p839_p6, %p836_p5 }
 0x4c9   :  { %844 = shalt.err (!%p841_p7)
}
 0x4ca   :  { %617 = dma.vmem_to_hbm [thread:$0]  %s615_s29, 32, %s1076_s6, [#allocation3]  }
 0x4cb   :  { %845 = dma.done.wait [#allocation3], 32  }
 0x4cc   :  { %846 = vsyncadd [#allocation3], 4294967264 }
 0x4cd   :  { %621 = vsyncpa [#allocation3], 1 }

</bundles_post_ra>
